<compile_context>
chip_gen: v5e
topology: v5e:2x2
jax: 0.10.0
libtpu: 0.0.40
codegen_flags: <defaults>
</compile_context>

<pallas_src>
import jax
import jax.numpy as jnp
from jax import lax
from jax.experimental import pallas as pl
from jax.experimental.pallas import tpu as pltpu


def _self_attn_kernel(v_ref, w_ref, b_ref, o_ref):
    # v_ref: (B, S, F)   value tensor (q/k do not affect the output; see header)
    # w_ref: (F, F)      fc.weight in torch (out_features, in_features) layout
    # b_ref: (1, F)      fc.bias
    # o_ref: (B, S*F)    lane-dense output slab; reshaped to (B, S, F) outside
    B, S, F = v_ref.shape

    v = v_ref[...].astype(jnp.float32)                  # (B, S, F)
    vsum = jnp.sum(v, axis=1)                           # (B, F): sum over seq

    # fc: vsum @ W.T + b, transpose folded into dot_general
    # (contract vsum's feature axis with W's in_features axis).
    w = w_ref[...].astype(jnp.float32)                  # (F_out, F_in)
    row = lax.dot_general(
        vsum, w, (((1,), (1,)), ((), ())),
        preferred_element_type=jnp.float32)              # (B, F_out)
    row = row + b_ref[...].astype(jnp.float32)           # (B, F)

    # Broadcast over the sequence axis, laid out lane-dense as (B, S*F):
    # out_flat[b, s*F + f] == row[b, f] for every s.
    out_flat = jnp.concatenate([row] * S, axis=-1)       # (B, S*F)
    o_ref[...] = out_flat.astype(o_ref.dtype)


def self_attention_pallas(q, k, v, w_fc, b_fc, n_heads):
    """Mirrors SelfAttention.forward(query, key, value).

    q, k, v: (B, S, F);  w_fc: (F, F) torch (out, in);  b_fc: (F,).
    q, k and n_heads are accepted for API parity but do not influence the
    result (see factorization note at the top of this file).
    """
    del q, k, n_heads  # mathematically irrelevant to the reference output
    B, S, F = v.shape
    b2 = b_fc.reshape(1, F)

    out_flat = pl.pallas_call(
        _self_attn_kernel,
        out_shape=jax.ShapeDtypeStruct((B, S * F), v.dtype),
        grid=(1,),
        in_specs=[
            pl.BlockSpec((B, S, F), lambda i: (0, 0, 0)),   # value
            pl.BlockSpec((F, F), lambda i: (0, 0)),         # fc.weight
            pl.BlockSpec((1, F), lambda i: (0, 0)),         # fc.bias
        ],
        out_specs=pl.BlockSpec((B, S * F), lambda i: (0, 0)),
        compiler_params=pltpu.CompilerParams(
            dimension_semantics=("arbitrary",)),
    )(v, w_fc, b2)

    return out_flat.reshape(B, S, F)


def self_attention_ref(q, k, v, w_fc, b_fc, n_heads):
    """Pure-JAX reference mirroring the PyTorch forward exactly (unfactorized)."""
    B, S, F = q.shape
    D = F // n_heads
    qh = q.reshape(B, S, n_heads, D)
    kh = k.reshape(B, S, n_heads, D)
    vh = v.reshape(B, S, n_heads, D)
    energy = jnp.einsum('bqnd,bknd->bnqk', qh, kh)
    att = jax.nn.softmax(energy / jnp.sqrt(jnp.float32(D)), axis=3)
    sa = jnp.einsum('bnqk,bvnd->bqnd', att, vh)
    sa = sa.reshape(B, S, F)
    return sa @ w_fc.T + b_fc


if __name__ == "__main__":
    B, S = 2, 8
    feature_size, n_heads = 32, 4

    key = jax.random.PRNGKey(0)
    kq, kk, kv, kw, kb = jax.random.split(key, 5)
    q = jax.random.normal(kq, (B, S, feature_size), dtype=jnp.float32)
    k = jax.random.normal(kk, (B, S, feature_size), dtype=jnp.float32)
    v = jax.random.normal(kv, (B, S, feature_size), dtype=jnp.float32)

    # fc = nn.Linear(feature_size, feature_size): weight (F, F), bias (F,)
    # (self.query/key/value Linears are declared but never used in forward.)
    w_fc = jax.random.normal(kw, (feature_size, feature_size),
                             dtype=jnp.float32) * 0.1
    b_fc = jax.random.normal(kb, (feature_size,), dtype=jnp.float32) * 0.1

    out = self_attention_pallas(q, k, v, w_fc, b_fc, n_heads)
    out = jax.block_until_ready(out)

    ref = self_attention_ref(q, k, v, w_fc, b_fc, n_heads)
    assert out.shape == (B, S, feature_size)
    max_diff = jnp.max(jnp.abs(out - ref))
    assert jnp.allclose(out, ref, atol=1e-4, rtol=1e-4), (
        f"max abs diff {max_diff}")

    print("KERNEL_OK")
</pallas_src>

<mosaic_0001>
module attributes {stable_mosaic.version = 11 : i64} {
  func.func @_self_attn_kernel(%arg0: i32, %arg1: memref<2x8x32xf32, #tpu.memory_space<vmem>>, %arg2: memref<32x32xf32, #tpu.memory_space<vmem>>, %arg3: memref<1x32xf32, #tpu.memory_space<vmem>>, %arg4: memref<2x256xf32, #tpu.memory_space<vmem>>) attributes {dimension_semantics = [#tpu.dimension_semantics<arbitrary>], iteration_bounds = array<i64: 1>, scalar_prefetch = 0 : i64, scratch_operands = 0 : i64, tpu.core_type = #tpu.core_type<tc>, window_params = [{pipeline_mode = #tpu.pipeline_mode<synchronous>, transform_indices = @transform_0, window_bounds = array<i64: 2, 8, 32>}, {pipeline_mode = #tpu.pipeline_mode<synchronous>, transform_indices = @transform_1, window_bounds = array<i64: 32, 32>}, {pipeline_mode = #tpu.pipeline_mode<synchronous>, transform_indices = @transform_2, window_bounds = array<i64: 1, 32>}, {pipeline_mode = #tpu.pipeline_mode<synchronous>, transform_indices = @transform_3, window_bounds = array<i64: 2, 256>}]} {
    %c0 = arith.constant 0 : index
    %c0_0 = arith.constant 0 : index
    %c0_1 = arith.constant 0 : index
    %0 = vector.load %arg1[%c0, %c0_0, %c0_1] : memref<2x8x32xf32, #tpu.memory_space<vmem>>, vector<2x8x32xf32>
    %cst = arith.constant dense<0.000000e+00> : vector<2x32xf32>
    %1 = vector.multi_reduction <add>, %0, %cst [1] : vector<2x8x32xf32> to vector<2x32xf32>
    %c0_2 = arith.constant 0 : index
    %c0_3 = arith.constant 0 : index
    %2 = vector.load %arg2[%c0_2, %c0_3] : memref<32x32xf32, #tpu.memory_space<vmem>>, vector<32x32xf32>
    %cst_4 = arith.constant dense<0.000000e+00> : vector<2x32xf32>
    %3 = tpu.matmul %1, %2, %cst_4 {dimension_numbers = #tpu.dot_dimension_numbers<[1], [1], [0], [0], [0, 0, 1, 0], [], []>} : vector<2x32xf32>, vector<32x32xf32>, vector<2x32xf32> -> vector<2x32xf32>
    %c0_5 = arith.constant 0 : index
    %c0_6 = arith.constant 0 : index
    %4 = vector.load %arg3[%c0_5, %c0_6] : memref<1x32xf32, #tpu.memory_space<vmem>>, vector<1x32xf32>
    %5 = vector.broadcast %4 : vector<1x32xf32> to vector<2x32xf32>
    %6 = arith.addf %3, %5 : vector<2x32xf32>
    %7 = tpu.concatenate %6, %6, %6, %6, %6, %6, %6, %6 in 1 : vector<2x32xf32>, vector<2x32xf32>, vector<2x32xf32>, vector<2x32xf32>, vector<2x32xf32>, vector<2x32xf32>, vector<2x32xf32>, vector<2x32xf32> -> vector<2x256xf32>
    %c0_7 = arith.constant 0 : index
    %c0_8 = arith.constant 0 : index
    %8 = vector.load %arg4[%c0_7, %c0_8] : memref<2x256xf32, #tpu.memory_space<vmem>>, vector<2x256xf32>
    tpu.vector_store %arg4[%c0_7, %c0_8], %7 {strides = array<i32>} : memref<2x256xf32, #tpu.memory_space<vmem>>, vector<2x256xf32>,
    return
  }
  func.func @transform_0(%arg0: i32) -> (i32, i32, i32) {
    %c0_i32 = arith.constant 0 : i32
    %c0_i32_0 = arith.constant 0 : i32
    %c0_i32_1 = arith.constant 0 : i32
    %c0_i32_2 = arith.constant 0 : i32
    return %c0_i32, %c0_i32_0, %c0_i32_1 : i32, i32, i32
  }
  func.func @transform_1(%arg0: i32) -> (i32, i32) {
    %c0_i32 = arith.constant 0 : i32
    %c0_i32_0 = arith.constant 0 : i32
    %c0_i32_1 = arith.constant 0 : i32
    return %c0_i32, %c0_i32_0 : i32, i32
  }
  func.func @transform_2(%arg0: i32) -> (i32, i32) {
    %c0_i32 = arith.constant 0 : i32
    %c0_i32_0 = arith.constant 0 : i32
    %c0_i32_1 = arith.constant 0 : i32
    return %c0_i32, %c0_i32_0 : i32, i32
  }
  func.func @transform_3(%arg0: i32) -> (i32, i32) {
    %c0_i32 = arith.constant 0 : i32
    %c0_i32_0 = arith.constant 0 : i32
    %c0_i32_1 = arith.constant 0 : i32
    return %c0_i32, %c0_i32_0 : i32, i32
  }
}

</mosaic_0001>

<bundles_post_ra>
// kernel: tpu_custom_call.1
= control target key start
LH: loop header
LB: loop body
LE: loop exit
PB: predicated region body
PF: predicated region fallthrough
CT: control target
= control target key end

     0   :  { %8 = vsyncpa [#allocation3], 0  ;;  %s289_s0 = inlined_call_operand.hbm [shape: f32[2,8,32], index: 0, kind: input, shape index: {}]   ;;  %s290_s1 = inlined_call_operand.hbm [shape: f32[32,32], index: 1, kind: input, shape index: {}]   ;;  %s291_s2 = inlined_call_operand.vmem [shape: f32[1,32], index: 2, kind: input, shape index: {}]   ;;  %s292_s3 = inlined_call_operand.hbm [shape: f32[2,256], index: 3, kind: output, shape index: {}]  }
   0x1   :  { %9 = vsyncpa [#allocation6], 0 }
   0x2   :  { %10 = vsyncpa [#allocation4], 0  ;;  %s15_s14 = sshll.u32 %s289_s0, 4  ;;  %s241_s15 = smov [#allocation2]   ;;  %s16_s14 = int_to_ptr.hbm [resolvable:$true] %s15_s14 }
   0x3   :  { %s17_s16 = sshll.u32 %s241_s15, 4  ;;  %s28_s19 = sshll.u32 %s290_s1, 4  ;;  %s18_s16 = int_to_ptr.vmem [resolvable:$true] %s17_s16  ;;  %s29_s19 = int_to_ptr.hbm [resolvable:$true] %s28_s19 }
   0x4   :  { %s242_s20 = smov 128   ;;  %s243_s21 = smov 8  }
   0x5   :  { %23 = dma.hbm_to_vmem [thread:$0]  %s16_s14, 256, %s18_s16, [#allocation3], %s242_s20, %s242_s20, %s243_s21  }
   0x6   :  { %s244_s22 = smov [#allocation5]  }
   0x7   :  { %s30_s23 = sshll.u32 %s244_s22, 4  ;;  %s31_s23 = int_to_ptr.vmem [resolvable:$true] %s30_s23 }
   0x8   :  { %36 = dma.hbm_to_vmem [thread:$0]  %s29_s19, 512, %s31_s23, [#allocation6], %s242_s20, %s242_s20, %s243_s21  }
   0x9   :  { %235 = dma.done.wait [#allocation3], 256  }
   0xa   :  { %236 = vsyncadd [#allocation3], 4294967040 }
   0xb   :  { %237 = dma.done.wait [#allocation6], 512  }
   0xc   :  { %238 = vsyncadd [#allocation6], 4294966784  ;;  %vm49_vm0 = vcmask 261120   ;;  %v67_v0 = vld [vmem:[#allocation5 + $0x18] sm:$0xff]  ;;  %v47_v1 = vld [vmem:[#allocation2] sm:$0xff]  ;;  %vm74_vm1 = vcmask 1041409  }
   0xd   :  { %149 = vmatpush.xpose.msk.msra.mxu0 %vm49_vm0, %v67_v0  ;;  %v48_v2 = vld [vmem:[#allocation2 + $0x8] sm:$0xff]  ;;  %v66_v3 = vld [vmem:[#allocation5 + $0x10] sm:$0xff]  ;;  %v50_v4 = vsel %vm49_vm0, %v47_v1, 0.0  ;;  %v65_v10 = vld [vmem:[#allocation5 + $0x8] sm:$0xff]  ;;  %s245_s24 = smov 96   ;;  %s246_s25 = smov 32  }
   0xe   :  { %v57_v5 = vsel %vm49_vm0, %v48_v2, 0.0  ;;  %v51_v6 = vrot.slane %v50_v4, 4  ;;  %v64_v15 = vld [vmem:[#allocation5] sm:$0xff]  ;;  %v162_v21 = vld [vmem:[%s291_s2] ss:$0 sm:$0xff]  ;;  %s247_s26 = smov 64  }
   0xf   :  { %v58_v7 = vrot.slane %v57_v5, 4  ;;  %vm121_vm2 = vcmask 523264   ;;  %vm123_vm3 = vcmask 785408   ;;  %s248_s27 = smov [#allocation7]   ;;  %s138_s30 = sshll.u32 %s292_s3, 4  ;;  %vm127_vm4 = vcmask 1041408   ;;  %s139_s30 = int_to_ptr.hbm [resolvable:$true] %s138_s30 }
  0x10   :  { %v52_v8 = vadd.f32 %v51_v6, %v50_v4  ;;  %s136_s28 = sshll.u32 %s248_s27, 4  ;;  %s137_s28 = int_to_ptr.vmem [resolvable:$true] %s136_s28 }
  0x11   :  { %150 = vmatpush.xpose.msk.msra.mxu0 %vm49_vm0, %v66_v3  ;;  %v59_v9 = vadd.f32 %v58_v7, %v57_v5 }
  0x12   :  { %v53_v11 = vrot.slane %v52_v8, 2 }
  0x13   :  { %v60_v12 = vrot.slane %v59_v9, 2 }
  0x14   :  { %v54_v13 = vadd.f32 %v53_v11, %v52_v8 }
  0x15   :  { %151 = vmatpush.xpose.msk.msra.mxu0 %vm49_vm0, %v65_v10  ;;  %v61_v14 = vadd.f32 %v60_v12, %v59_v9 }
  0x16   :  { %v55_v16 = vrot.slane %v54_v13, 1 }
  0x17   :  { %v62_v17 = vrot.slane %v61_v14, 1 }
  0x18   :  { %v56_v18 = vadd.f32 %v55_v16, %v54_v13 }
  0x19   :  { %152 = vmatpush.xpose.msk.msra.mxu0 %vm49_vm0, %v64_v15  ;;  %v63_v19 = vadd.f32 %v62_v17, %v61_v14 }
  0x1b   :  { %v75_v20 = vsel %vm74_vm1, %v63_v19, %v56_v18 }
  0x1c   :  { %153 = vmatmul.msk.f32.vlgmr.msra.gmra.mxu0 %vm49_vm0, %v75_v20 }
  0x99   :  { %v107_v22 = vpop.f32.mrf.mxu0 }
  0x9a   :  { %v108_v23 = vadd.f32 %v162_v21, %v107_v22 }
  0x9c   :  { %117 = vrot.lane.b32.xlu1 %v108_v23, %s245_s24  ;;  %111 = vrot.lane.b32.xlu0 %v108_v23, %s246_s25 }
  0xa4   :  { %114 = vrot.lane.b32.xlu0 %v108_v23, %s247_s26 }
 0x10e   :  { %v112_v24 = vpop.permute.xlu0 %111  ;;  %v118_v27 = vpop.permute.xlu1 %117 }
 0x10f   :  { %v120_v25 = vsel %vm49_vm0, %v108_v23, %v112_v24 }
 0x116   :  { %v115_v26 = vpop.permute.xlu0 %114 }
 0x117   :  { %v122_v28 = vsel %vm121_vm2, %v120_v25, %v115_v26 }
 0x118   :  { %v124_v29 = vsel %vm123_vm3, %v122_v28, %v118_v27 }
 0x119   :  { %v126_v30 = vrot.slane %v124_v29, 6 }
 0x11b   :  { %v128_v31 = vsel %vm127_vm4, %v124_v29, %v126_v30 }
 0x11c   :  { %130 = vst [vmem:[#allocation7] sm:$0xf] %v128_v31 }
 0x11d   :  { %141 = dma.vmem_to_hbm [thread:$0]  %s137_s28, 64, %s139_s30, [#allocation4]  }
 0x11e   :  { %239 = dma.done.wait [#allocation4], 64  }
 0x11f   :  { %240 = vsyncadd [#allocation4], 4294967232 }
 0x120   :  { %146 = vsyncpa [#allocation3], 1 }
 0x121   :  { %147 = vsyncpa [#allocation6], 1 }
 0x122   :  { %148 = vsyncpa [#allocation4], 1 }

</bundles_post_ra>
